<compile_context>
chip_gen: v5e
topology: v5e:2x2
jax: 0.10.0
libtpu: 0.0.40
codegen_flags: <defaults>
</compile_context>

<pallas_src>
import functools

import jax
import jax.numpy as jnp
from jax import lax
from jax.experimental import pallas as pl
from jax.experimental.pallas import tpu as pltpu


def _cdiv(a: int, b: int) -> int:
    return -(-a // b)


def _round_up(x: int, m: int) -> int:
    return _cdiv(x, m) * m


def _physical_vmem_bytes() -> int:
    try:
        return int(pltpu.get_tpu_info().vmem_capacity_bytes)
    except Exception:
        return 64 * 1024 * 1024  # conservative (v7x-sized) fallback


def _plan_tiles(B: int, K: int, N: int, budget: int):
    """Pick (tm, tn, tk) for the tiled path.

    Legal TPU blocks: tm a multiple of 8, tn a multiple of 128, tk a multiple
    of 128 OR exactly K (whole-K-resident, the preferred plan: no reduction
    loop, no accumulator revisits, no K-tail masking).
    """

    def usage(tm, tn, tk):  # double-buffered f32 in/out tiles
        return 8 * (tm * tk + tn * tk + tn + tm * tn)

    tm_opts = [t for t in (512, 256, 128, 64, 32, 16, 8) if t <= _round_up(B, 8)] or [8]
    tn_opts = [t for t in (512, 256, 128) if t <= _round_up(N, 128)] or [128]
    tk_opts = [K] + [t for t in (1024, 512, 256, 128) if t < K]

    for tk in tk_opts:
        for tn in tn_opts:
            for tm in tm_opts:
                if usage(tm, tn, tk) <= budget:
                    return tm, tn, tk
    return 8, 128, 128  # last resort: minimal legal tiles


def _linear_onepass_kernel(x_ref, w_ref, b_ref, o_ref):
    # x: (B, K)  w: (N, K)  b: (1, N)  o: (B, N). Contract the shared K axis;
    # the weight stays in PyTorch (out, in) layout — no HBM transpose.
    o_ref[...] = (
        lax.dot_general(
            x_ref[...],
            w_ref[...],
            dimension_numbers=(((1,), (1,)), ((), ())),
            preferred_element_type=jnp.float32,
        )
        + b_ref[...]
    ).astype(o_ref.dtype)


def _linear_tiled_kernel(x_ref, w_ref, b_ref, o_ref, *, k_total, tk, ragged_k):
    # x: (tm, tk)  w: (tn, tk)  b: (1, tn)  o: (tm, tn), resident across k
    # (output index_map ignores k and k is the innermost grid axis).
    k = pl.program_id(2)

    @pl.when(k == 0)
    def _():
        # Fold the bias in as the accumulator initializer: keeps the VPU add
        # off the K loop and removes the need for a separate epilogue.
        o_ref[...] = jnp.broadcast_to(b_ref[...], o_ref.shape).astype(o_ref.dtype)

    x = x_ref[...]
    w = w_ref[...]
    if ragged_k:
        # The last K tile sticks out past the array: zero the out-of-bounds
        # columns of BOTH operands so stale VMEM (possibly NaN/Inf) never
        # reaches the MXU accumulation.
        kpos = k * tk + lax.broadcasted_iota(jnp.int32, (1, tk), 1)
        kmask = kpos < k_total
        x = jnp.where(kmask, x, 0.0)
        w = jnp.where(kmask, w, 0.0)

    # Contract x's K axis (dim 1) against the weight's K axis (dim 1).
    # TODO(synk): if a bundle dump ever shows per-tile vxpose in the K loop AND
    # the kernel is MXU-bound (large B), pre-transpose the reused weight to
    # (K, N) once in HBM instead of paying XLU transposes per tile.
    o_ref[...] += lax.dot_general(
        x,
        w,
        dimension_numbers=(((1,), (1,)), ((), ())),
        preferred_element_type=jnp.float32,
    )


@functools.partial(jax.jit, static_argnames=("block_sizes",))
def linear_forward(x, weight, bias, block_sizes=None):
    """y = x @ weight.T + bias   (PyTorch nn.Linear semantics).

    x:      (B, in_features)             float32
    weight: (out_features, in_features)  float32 (PyTorch layout, NOT transposed)
    bias:   (out_features,)              float32
    block_sizes: optional static (tm, tn, tk) override (tm % 8 == 0,
                 tn % 128 == 0, tk % 128 == 0 or tk == in_features).
    returns (B, out_features)            float32
    """
    B, K = x.shape
    N, K2 = weight.shape
    assert K == K2 and bias.shape == (N,)

    out_dtype = jnp.float32
    b2 = bias.reshape(1, N)  # tiny, lane-major 2-D view of the bias

    phys = _physical_vmem_bytes()
    # ~48 MiB on v7x (64 MiB physical), ~96 MiB on v5e/v6e (128 MiB physical).
    vmem_limit = min(phys * 3 // 4, 100 * 1024 * 1024)
    tile_budget = int(vmem_limit * 0.85)  # headroom for compiler scratch

    flops = 2 * B * N * K

    # ---- Fast path: whole problem comfortably fits in VMEM ----------------
    total_bytes = 4 * (B * K + N * K + N + B * N)
    if block_sizes is None and total_bytes <= min(tile_budget, 4 * 1024 * 1024):
        cost = pl.CostEstimate(
            flops=flops, transcendentals=0, bytes_accessed=total_bytes
        )
        return pl.pallas_call(
            _linear_onepass_kernel,
            out_shape=jax.ShapeDtypeStruct((B, N), out_dtype),
            compiler_params=pltpu.CompilerParams(vmem_limit_bytes=vmem_limit),
            cost_estimate=cost,
        )(x, weight, b2)

    # ---- General tiled path ------------------------------------------------
    if block_sizes is None:
        tm, tn, tk = _plan_tiles(B, K, N, tile_budget)
        # v7x has 2 TensorCores: guarantee >= 2 blocks along a parallel axis.
        if _cdiv(B, tm) == 1 and _cdiv(N, tn) == 1 and N > 128:
            tn = max(128, _round_up(_cdiv(N, 2), 128))
    else:
        tm, tn, tk = block_sizes

    gm, gn, gk = _cdiv(B, tm), _cdiv(N, tn), _cdiv(K, tk)
    ragged_k = (K % tk) != 0

    kernel = functools.partial(
        _linear_tiled_kernel, k_total=K, tk=tk, ragged_k=ragged_k
    )
    cost = pl.CostEstimate(
        flops=flops,
        transcendentals=0,
        # Actual traffic including tile re-reads: x re-read per N block,
        # weight re-read per M block, bias per M block, output once.
        bytes_accessed=4 * (B * K * gn + N * K * gm + N * gm + B * N),
    )
    return pl.pallas_call(
        kernel,
        out_shape=jax.ShapeDtypeStruct((B, N), out_dtype),
        grid=(gm, gn, gk),
        in_specs=[
            pl.BlockSpec((tm, tk), lambda i, j, k: (i, k)),  # x tile
            pl.BlockSpec((tn, tk), lambda i, j, k: (j, k)),  # weight tile (out, in)
            pl.BlockSpec((1, tn), lambda i, j, k: (0, j)),   # bias tile
        ],
        out_specs=pl.BlockSpec((tm, tn), lambda i, j, k: (i, j)),
        compiler_params=pltpu.CompilerParams(
            dimension_semantics=("parallel", "parallel", "arbitrary"),
            vmem_limit_bytes=vmem_limit,
        ),
        cost_estimate=cost,
    )(x, weight, b2)


def init_net_params(key, input_size, output_size):
    """Deterministic init matching nn.Linear's default (uniform in +-1/sqrt(in))."""
    kw, kb = jax.random.split(key)
    bound = 1.0 / jnp.sqrt(jnp.float32(input_size))
    weight = jax.random.uniform(
        kw, (output_size, input_size), jnp.float32, minval=-bound, maxval=bound
    )
    bias = jax.random.uniform(
        kb, (output_size,), jnp.float32, minval=-bound, maxval=bound
    )
    return weight, bias


def _ref_linear(x, w, b):
    return jnp.dot(x, w.T, precision=lax.Precision.HIGHEST) + b


if __name__ == "__main__":
    key = jax.random.PRNGKey(0)
    k_x1, k_p1, k_x2, k_p2, k_x3, k_p3 = jax.random.split(key, 6)

    # --- 1. The spec's demo shape: single-shot fast path --------------------
    batch, input_size, output_size = 8, 32, 16
    x1 = jax.random.normal(k_x1, (batch, input_size), jnp.float32)
    w1, b1 = init_net_params(k_p1, input_size, output_size)
    y1 = jax.block_until_ready(linear_forward(x1, w1, b1))
    assert y1.shape == (batch, output_size)
    assert jnp.allclose(y1, _ref_linear(x1, w1, b1), atol=1e-4, rtol=1e-4), (
        "single-shot path mismatch"
    )

    # --- 2. Larger shape: exercises the tiled, whole-K-resident path --------
    B2, D2, F2 = 256, 2048, 1536
    x2 = jax.random.normal(k_x2, (B2, D2), jnp.float32)
    w2, b2 = init_net_params(k_p2, D2, F2)
    y2 = jax.block_until_ready(linear_forward(x2, w2, b2))
    assert y2.shape == (B2, F2)
    assert jnp.allclose(y2, _ref_linear(x2, w2, b2), atol=2e-2, rtol=2e-2), (
        "tiled path mismatch"
    )

    # --- 3. Ragged M/N/K with forced small blocks: exercises the K-tail mask
    B3, D3, F3 = 48, 300, 200
    x3 = jax.random.normal(k_x3, (B3, D3), jnp.float32)
    w3, b3 = init_net_params(k_p3, D3, F3)
    y3 = jax.block_until_ready(
        linear_forward(x3, w3, b3, block_sizes=(32, 128, 128))
    )
    assert y3.shape == (B3, F3)
    assert jnp.allclose(y3, _ref_linear(x3, w3, b3), atol=2e-2, rtol=2e-2), (
        "masked ragged-K path mismatch"
    )

    print("KERNEL_OK")
</pallas_src>

<mosaic_0001>
module attributes {stable_mosaic.version = 11 : i64} {
  func.func @_linear_onepass_kernel(%arg0: memref<8x32xf32, #tpu.memory_space<vmem>>, %arg1: memref<16x32xf32, #tpu.memory_space<vmem>>, %arg2: memref<1x16xf32, #tpu.memory_space<vmem>>, %arg3: memref<8x16xf32, #tpu.memory_space<vmem>>) attributes {dimension_semantics = [], scalar_prefetch = 0 : i64, scratch_operands = 0 : i64, tpu.core_type = #tpu.core_type<tc>} {
    %c0 = arith.constant 0 : index
    %c0_0 = arith.constant 0 : index
    %0 = vector.load %arg0[%c0, %c0_0] : memref<8x32xf32, #tpu.memory_space<vmem>>, vector<8x32xf32>
    %c0_1 = arith.constant 0 : index
    %c0_2 = arith.constant 0 : index
    %1 = vector.load %arg1[%c0_1, %c0_2] : memref<16x32xf32, #tpu.memory_space<vmem>>, vector<16x32xf32>
    %cst = arith.constant dense<0.000000e+00> : vector<8x16xf32>
    %2 = tpu.matmul %0, %1, %cst {dimension_numbers = #tpu.dot_dimension_numbers<[1], [1], [0], [0], [0, 0, 1, 0], [], []>} : vector<8x32xf32>, vector<16x32xf32>, vector<8x16xf32> -> vector<8x16xf32>
    %c0_3 = arith.constant 0 : index
    %c0_4 = arith.constant 0 : index
    %3 = vector.load %arg2[%c0_3, %c0_4] : memref<1x16xf32, #tpu.memory_space<vmem>>, vector<1x16xf32>
    %4 = vector.broadcast %3 : vector<1x16xf32> to vector<8x16xf32>
    %5 = arith.addf %2, %4 : vector<8x16xf32>
    %c0_5 = arith.constant 0 : index
    %c0_6 = arith.constant 0 : index
    %6 = vector.load %arg3[%c0_5, %c0_6] : memref<8x16xf32, #tpu.memory_space<vmem>>, vector<8x16xf32>
    tpu.vector_store %arg3[%c0_5, %c0_6], %5 {strides = array<i32>} : memref<8x16xf32, #tpu.memory_space<vmem>>, vector<8x16xf32>,
    return
  }
}

</mosaic_0001>

<bundles_post_ra>
// kernel: linear_forward.1
= control target key start
LH: loop header
LB: loop body
LE: loop exit
PB: predicated region body
PF: predicated region fallthrough
CT: control target
= control target key end

     0   :  { %8 = vsyncpa [#allocation3], 0  ;;  %s226_s0 = inlined_call_operand.hbm [shape: f32[8,32], index: 0, kind: input, shape index: {}]   ;;  %s227_s1 = inlined_call_operand.hbm [shape: f32[16,32], index: 1, kind: input, shape index: {}]   ;;  %s228_s2 = inlined_call_operand.vmem [shape: f32[1,16], index: 2, kind: input, shape index: {}]   ;;  %s229_s3 = inlined_call_operand.hbm [shape: f32[8,16], index: 3, kind: output, shape index: {}]  }
   0x1   :  { %9 = vsyncpa [#allocation6], 0 }
   0x2   :  { %10 = vsyncpa [#allocation4], 0  ;;  %s16_s14 = sshll.u32 %s226_s0, 4  ;;  %s189_s15 = smov [#allocation2]   ;;  %s17_s14 = int_to_ptr.hbm [resolvable:$true] %s16_s14 }
   0x3   :  { %s18_s16 = sshll.u32 %s189_s15, 4  ;;  %s26_s19 = sshll.u32 %s227_s1, 4  ;;  %s19_s16 = int_to_ptr.vmem [resolvable:$true] %s18_s16  ;;  %s27_s19 = int_to_ptr.hbm [resolvable:$true] %s26_s19 }
   0x4   :  { %21 = dma.hbm_to_vmem [thread:$0]  %s17_s14, 128, %s19_s16, [#allocation3]  }
   0x5   :  { %s190_s20 = smov [#allocation5]   ;;  %s191_s22 = smov 128  }
   0x6   :  { %s28_s21 = sshll.u32 %s190_s20, 4  ;;  %s192_s23 = smov 8   ;;  %s29_s21 = int_to_ptr.vmem [resolvable:$true] %s28_s21 }
   0x7   :  { %34 = dma.hbm_to_vmem [thread:$0]  %s27_s19, 256, %s29_s21, [#allocation6], %s191_s22, %s191_s22, %s192_s23  }
   0x8   :  { %183 = dma.done.wait [#allocation3], 128  }
   0x9   :  { %184 = vsyncadd [#allocation3], 4294967168 }
   0xa   :  { %185 = dma.done.wait [#allocation6], 256  }
   0xb   :  { %186 = vsyncadd [#allocation6], 4294967040  ;;  %vm52_vm0 = vcmask 261120   ;;  %v47_v0 = vld [vmem:[#allocation5 + $0x8] sm:$0xff]  ;;  %v46_v1 = vld [vmem:[#allocation5] sm:$0xff]  ;;  %s193_s24 = smov [#allocation7]  }
   0xc   :  { %102 = vmatpush.xpose.msk.msra.mxu0 %vm52_vm0, %v47_v0  ;;  %v45_v2 = vld [vmem:[#allocation2] sm:$0xff]  ;;  %s89_s25 = sshll.u32 %s193_s24, 4  ;;  %s91_s28 = sshll.u32 %s229_s3, 4  ;;  %vm82_vm1 = vcmask 130048   ;;  %s90_s25 = int_to_ptr.vmem [resolvable:$true] %s89_s25  ;;  %s92_s28 = int_to_ptr.hbm [resolvable:$true] %s91_s28 }
   0xd   :  { %v110_v3 = vld [vmem:[%s228_s2] ss:$0 sm:$0xff] }
  0x10   :  { %103 = vmatpush.xpose.msk.msra.mxu0 %vm52_vm0, %v46_v1 }
  0x13   :  { %104 = vmatmul.msk.f32.vlgmr.msra.gmra.mxu0 %vm52_vm0, %v45_v2 }
  0x90   :  { %v79_v4 = vpop.f32.mrf.mxu0 }
  0x91   :  { %v80_v5 = vadd.f32 %v110_v3, %v79_v4 }
  0x93   :  { %83 = vst.msk [vmem:[#allocation7] sm:$0xff] %vm82_vm1, %v80_v5 }
  0x94   :  { %94 = dma.vmem_to_hbm [thread:$0]  %s90_s25, 128, %s92_s28, [#allocation4]  }
  0x95   :  { %187 = dma.done.wait [#allocation4], 128  }
  0x96   :  { %188 = vsyncadd [#allocation4], 4294967168 }
  0x97   :  { %99 = vsyncpa [#allocation3], 1 }
  0x98   :  { %100 = vsyncpa [#allocation6], 1 }
  0x99   :  { %101 = vsyncpa [#allocation4], 1 }

</bundles_post_ra>
